<compile_context>
chip_gen: v5e
topology: v5e:2x2
jax: 0.10.0
libtpu: 0.0.40
codegen_flags: <defaults>
</compile_context>

<pallas_src>
import functools

import numpy as np
import jax
import jax.numpy as jnp
from jax.experimental import pallas as pl
from jax.experimental.pallas import tpu as pltpu


# ----------------------------- configuration --------------------------------
LATENT_DIM = 8
INPUT_CHANNELS = 1
INPUT_SIZE = 64                      # 1-D spatial grid
KERNEL_SIZE = 3
POOL = 2
HIDDEN_CHANNELS_VAE = [4, 8]         # encoder: 1->4->8 ; decoder mirrors it
HIDDEN_CHANNELS_DFT = [4, 8]
DX = 1.0 / INPUT_SIZE
L_SMALL = INPUT_SIZE // (POOL ** len(HIDDEN_CHANNELS_VAE))   # 16

# weight-slab layout (rows, all 8-aligned; lane width padded to 256 everywhere)
_BLOCK_ROWS = (8, 256, 256, 64, 256)                     # W0, W1, W2, W3, W4
_BLOCK_OFF = tuple(int(o) for o in np.cumsum((0,) + _BLOCK_ROWS)[:5])
_W_ALL_ROWS = int(sum(_BLOCK_ROWS))                      # 840
_SLAB_LANES = 256
_OUT_LANES = 128                                         # packed output width


# ------------------------------- fused kernel --------------------------------
def fused_forward_kernel(z_ref, w_ref, b_ref, out_ref, *, dx):
    f32 = jnp.float32
    z = z_ref[...]                                                     # (TB, 8)

    # L0: dec_fc (8 -> 8ch*16 = 128) + ReLU        [padded lanes >=128 stay exactly 0]
    h = jnp.dot(z, w_ref[pl.ds(_BLOCK_OFF[0], _BLOCK_ROWS[0]), :],
                preferred_element_type=f32)
    h = jnp.maximum(h + b_ref[pl.ds(0, 1), :], 0.0)                    # (TB, 256)

    # L1: fused [nearest-upsample x2 + dec_conv1 (8ch->4ch, K=3, pad=1)] + ReLU
    h = jnp.dot(h, w_ref[pl.ds(_BLOCK_OFF[1], _BLOCK_ROWS[1]), :],
                preferred_element_type=f32)
    h = jnp.maximum(h + b_ref[pl.ds(1, 1), :], 0.0)                    # (TB, 256)

    # L2: fused [nearest-upsample x2 + dec_conv2 (4ch->1ch, K=3, pad=1)]
    h = jnp.dot(h, w_ref[pl.ds(_BLOCK_OFF[2], _BLOCK_ROWS[2]), :],
                preferred_element_type=f32)
    h = (h + b_ref[pl.ds(2, 1), :])[:, :INPUT_SIZE]                    # (TB, 64)

    # stable softplus (matches torch incl. threshold=20 regime at fp32) + density norm
    sp = jnp.maximum(h, 0.0) + jnp.log1p(jnp.exp(-jnp.abs(h)))
    s = jnp.sum(sp, axis=-1, keepdims=True)                            # (TB, 1)
    x = sp / (s * dx)                                                  # sum(x)*dx == 1 (exact divide)

    # L3: dft_conv1 (1ch->4ch, K=3, pad=1) at L=64 + ReLU
    g = jnp.dot(x, w_ref[pl.ds(_BLOCK_OFF[3], _BLOCK_ROWS[3]), :],
                preferred_element_type=f32)
    g = jnp.maximum(g + b_ref[pl.ds(3, 1), :], 0.0)                    # (TB, 256)

    # L4: fused [avg-pool x2 + dft_conv2 (4ch->8ch, K=3, pad=1)] + ReLU
    g = jnp.dot(g, w_ref[pl.ds(_BLOCK_OFF[4], _BLOCK_ROWS[4]), :],
                preferred_element_type=f32)
    g = jnp.maximum(g + b_ref[pl.ds(4, 1), :], 0.0)                    # (TB, 256)

    # L5: fused [avg-pool x2 + flatten + dft_fc (128->1)] as VPU mul + lane reduce
    f = jnp.sum(g * b_ref[pl.ds(5, 1), :], axis=-1, keepdims=True)
    f = f + b_ref[pl.ds(6, 1), pl.ds(0, 1)]                            # (TB, 1)

    # pack outputs lane-dense: x -> lanes 0..63, f (broadcast) -> lanes 64..127
    out_ref[...] = jnp.concatenate(
        [x, jnp.broadcast_to(f, (x.shape[0], _OUT_LANES - INPUT_SIZE))],
        axis=-1).astype(out_ref.dtype)


def dftvae_norm_forward(z, p):
    """DFTVAEnorm.forward: x = Decoder(z); f = DFTModel(x); return (x.view(B,-1), f)."""
    B = z.shape[0]
    # Batch tile: multiple of 8 (f32 sublane), capped so per-tile activations stay
    # tiny even on v7x's 64 MiB VMEM (a 256-row tile keeps < ~1 MiB of temporaries).
    TB = ((B + 7) // 8) * 8
    if TB > 256:
        TB = 256
    B_pad = ((B + TB - 1) // TB) * TB
    if B_pad != B:
        z = jnp.pad(z, ((0, B_pad - B), (0, 0)))

    out = pl.pallas_call(
        functools.partial(fused_forward_kernel, dx=DX),
        grid=(B_pad // TB,),
        in_specs=[
            pl.BlockSpec((TB, LATENT_DIM), lambda i: (i, 0)),
            pl.BlockSpec(p["W_all"].shape, lambda i: (0, 0)),   # VMEM-resident weights
            pl.BlockSpec(p["b_all"].shape, lambda i: (0, 0)),   # VMEM-resident biases
        ],
        out_specs=pl.BlockSpec((TB, _OUT_LANES), lambda i: (i, 0)),
        out_shape=jax.ShapeDtypeStruct((B_pad, _OUT_LANES), jnp.float32),
        compiler_params=pltpu.CompilerParams(dimension_semantics=("parallel",)),
    )(z, p["W_all"], p["b_all"])

    x_flat = out[:B, :INPUT_SIZE]
    f = out[:B, INPUT_SIZE:INPUT_SIZE + 1]
    return x_flat, f


# ------------------- host-side (one-time) weight folding ---------------------
def _conv1d_to_matrix(w, L):
    """Conv1d (stride 1, 'zeros' pad=(K-1)//2) as a (Cin*L, Cout*L) matrix on flat (c*L+l) layout."""
    w = np.asarray(w, np.float64)
    Cout, Cin, K = w.shape
    pad = (K - 1) // 2
    A = np.zeros((Cin * L, Cout * L), np.float64)
    for o in range(Cout):
        for i in range(Cin):
            for k in range(K):
                for l in range(L):
                    m = l + k - pad
                    if 0 <= m < L:
                        A[i * L + m, o * L + l] += w[o, i, k]
    return A


def _upsample_matrix(C, Lin, p):
    """Nearest-neighbour upsample x p along L, flat layout: y[c*Lout+l] = x[c*Lin + l//p]."""
    Lout = Lin * p
    U = np.zeros((C * Lin, C * Lout), np.float64)
    for c in range(C):
        for l in range(Lout):
            U[c * Lin + l // p, c * Lout + l] = 1.0
    return U


def _pool_matrix(C, Lin, p):
    """Average pool x p along L, flat layout: y[c*Lout+l] = mean_j x[c*Lin + l*p + j]."""
    Lout = Lin // p
    P = np.zeros((C * Lin, C * Lout), np.float64)
    for c in range(C):
        for l in range(Lout):
            for j in range(p):
                P[c * Lin + l * p + j, c * Lout + l] = 1.0 / p
    return P


def _pad_block(W, rows, lanes=_SLAB_LANES):
    out = np.zeros((rows, lanes), np.float64)
    out[:W.shape[0], :W.shape[1]] = W
    return out


def prepare_fused_params(raw):
    hc = HIDDEN_CHANNELS_VAE
    hd = HIDDEN_CHANNELS_DFT

    # DecodeNorm fc: pre-transpose to (Din, Dout)
    W0 = np.asarray(raw["dec_fc_w"], np.float64).T                         # (8, 128)

    # upsample(16->32, 8ch) + dec_conv1 (8->4)
    U1 = _upsample_matrix(hc[1], L_SMALL, POOL)                            # (128, 256)
    A1 = _conv1d_to_matrix(raw["dec_conv1_w"], L_SMALL * POOL)             # (256, 128)
    W1 = U1 @ A1                                                           # (128, 128)

    # upsample(32->64, 4ch) + dec_conv2 (4->1)
    U2 = _upsample_matrix(hc[0], L_SMALL * POOL, POOL)                     # (128, 256)
    A2 = _conv1d_to_matrix(raw["dec_conv2_w"], INPUT_SIZE)                 # (256, 64)
    W2 = U2 @ A2                                                           # (128, 64)

    # dft_conv1 (1->4) at L=64
    W3 = _conv1d_to_matrix(raw["dft_conv1_w"], INPUT_SIZE)                 # (64, 256)

    # pool(64->32, 4ch) + dft_conv2 (4->8) at L=32
    P1 = _pool_matrix(hd[0], INPUT_SIZE, POOL)                             # (256, 128)
    A4 = _conv1d_to_matrix(raw["dft_conv2_w"], INPUT_SIZE // POOL)         # (128, 256)
    W4 = P1 @ A4                                                           # (256, 256)

    # pool(32->16, 8ch) + flatten + dft_fc (128->1), as a (1, 256) row for VPU mul+reduce
    P2 = _pool_matrix(hd[1], INPUT_SIZE // POOL, POOL)                     # (256, 128)
    wf = (P2 @ np.asarray(raw["dft_fc_w"], np.float64).T).T                # (1, 256)

    # --- single padded weight slab (840, 256), blocks at 8-aligned row offsets ---
    blocks = (W0, W1, W2, W3, W4)
    W_all = np.concatenate(
        [_pad_block(Wk, rows) for Wk, rows in zip(blocks, _BLOCK_ROWS)], axis=0)
    assert W_all.shape == (_W_ALL_ROWS, _SLAB_LANES)

    # --- single bias/vector slab (8, 256): one broadcast-expanded row per layer ---
    b_all = np.zeros((8, _SLAB_LANES), np.float64)
    b_all[0, :hc[1] * L_SMALL] = np.asarray(raw["dec_fc_b"], np.float64)
    b_all[1, :hc[0] * L_SMALL * POOL] = np.repeat(
        np.asarray(raw["dec_conv1_b"], np.float64), L_SMALL * POOL)
    b_all[2, :INPUT_CHANNELS * INPUT_SIZE] = np.repeat(
        np.asarray(raw["dec_conv2_b"], np.float64), INPUT_SIZE)
    b_all[3, :hd[0] * INPUT_SIZE] = np.repeat(
        np.asarray(raw["dft_conv1_b"], np.float64), INPUT_SIZE)
    b_all[4, :hd[1] * (INPUT_SIZE // POOL)] = np.repeat(
        np.asarray(raw["dft_conv2_b"], np.float64), INPUT_SIZE // POOL)
    b_all[5, :] = wf[0]
    b_all[6, 0] = np.asarray(raw["dft_fc_b"], np.float64).reshape(())

    return {"W_all": jnp.asarray(W_all, jnp.float32),
            "b_all": jnp.asarray(b_all, jnp.float32)}


# ------------------------------ raw parameters --------------------------------
def _normal(key, shape, scale=0.1):
    return scale * jax.random.normal(key, shape, dtype=jnp.float32)


def init_params(key):
    ks = jax.random.split(key, 12)
    hc = HIDDEN_CHANNELS_VAE
    hd = HIDDEN_CHANNELS_DFT
    K = KERNEL_SIZE
    return {
        # DecodeNorm (PyTorch-style shapes)
        "dec_fc_w": _normal(ks[0], (hc[-1] * L_SMALL, LATENT_DIM)),        # (128, 8)
        "dec_fc_b": _normal(ks[1], (hc[-1] * L_SMALL,)),
        "dec_conv1_w": _normal(ks[2], (hc[0], hc[1], K)),                  # 8 -> 4
        "dec_conv1_b": _normal(ks[3], (hc[0],)),
        "dec_conv2_w": _normal(ks[4], (INPUT_CHANNELS, hc[0], K)),         # 4 -> 1
        "dec_conv2_b": _normal(ks[5], (INPUT_CHANNELS,)),
        # DFTModel
        "dft_conv1_w": _normal(ks[6], (hd[0], INPUT_CHANNELS, K)),         # 1 -> 4
        "dft_conv1_b": _normal(ks[7], (hd[0],)),
        "dft_conv2_w": _normal(ks[8], (hd[1], hd[0], K)),                  # 4 -> 8
        "dft_conv2_b": _normal(ks[9], (hd[1],)),
        "dft_fc_w": _normal(ks[10], (1, hd[1] * (INPUT_SIZE // POOL ** 2))),
        "dft_fc_b": _normal(ks[11], (1,)),
    }


# --------------------------- pure-JAX reference --------------------------------
def _conv1d_ref(x, w, b):
    y = jax.lax.conv_general_dilated(
        x, w, window_strides=(1,), padding=[(1, 1)],
        dimension_numbers=("NCH", "OIH", "NCH"))
    return y + b.reshape(1, -1, 1)


def reference_forward(z, raw):
    B = z.shape[0]
    hc = HIDDEN_CHANNELS_VAE
    h = jnp.maximum(z @ raw["dec_fc_w"].T + raw["dec_fc_b"][None, :], 0.0)
    h = h.reshape(B, hc[-1], L_SMALL)
    h = jnp.repeat(h, POOL, axis=-1)
    h = jnp.maximum(_conv1d_ref(h, raw["dec_conv1_w"], raw["dec_conv1_b"]), 0.0)
    h = jnp.repeat(h, POOL, axis=-1)
    h = _conv1d_ref(h, raw["dec_conv2_w"], raw["dec_conv2_b"])
    y = jax.nn.softplus(h)
    x = y / (jnp.sum(y, axis=-1, keepdims=True) * DX)
    g = jnp.maximum(_conv1d_ref(x, raw["dft_conv1_w"], raw["dft_conv1_b"]), 0.0)
    g = g.reshape(B, g.shape[1], g.shape[2] // POOL, POOL).mean(axis=-1)
    g = jnp.maximum(_conv1d_ref(g, raw["dft_conv2_w"], raw["dft_conv2_b"]), 0.0)
    g = g.reshape(B, g.shape[1], g.shape[2] // POOL, POOL).mean(axis=-1)
    g = g.reshape(B, -1)
    f = g @ raw["dft_fc_w"].T + raw["dft_fc_b"][None, :]
    return x.reshape(B, -1), f


# -------------------------------- main -----------------------------------------
if __name__ == "__main__":
    key = jax.random.PRNGKey(0)
    k_z, k_p = jax.random.split(key)
    raw_params = init_params(k_p)
    fused_params = prepare_fused_params(raw_params)   # one-time host-side folding
    z = jax.random.normal(k_z, (2, LATENT_DIM), dtype=jnp.float32)

    fwd = jax.jit(dftvae_norm_forward)
    x_flat, f = fwd(z, fused_params)
    jax.block_until_ready((x_flat, f))

    assert x_flat.shape == (2, INPUT_CHANNELS * INPUT_SIZE)
    assert f.shape == (2, 1)
    # decoded density is normalised: sum(x) * dx == 1 (exact divide, fp32 accuracy)
    assert jnp.allclose(jnp.sum(x_flat, axis=-1) * DX, 1.0, atol=1e-4)
    # fused kernel matches the straightforward JAX composition of the same layers
    x_ref, f_ref = reference_forward(z, raw_params)
    assert jnp.allclose(x_flat, x_ref, atol=1e-2, rtol=1e-2)
    assert jnp.allclose(f, f_ref, atol=1e-2, rtol=1e-2)

    print("KERNEL_OK")
</pallas_src>

<mosaic_0001>
module attributes {stable_mosaic.version = 11 : i64} {
  func.func @fused_forward_kernel(%arg0: i32, %arg1: memref<8x8xf32, #tpu.memory_space<vmem>>, %arg2: memref<840x256xf32, #tpu.memory_space<vmem>>, %arg3: memref<8x256xf32, #tpu.memory_space<vmem>>, %arg4: memref<8x128xf32, #tpu.memory_space<vmem>>) attributes {dimension_semantics = [#tpu.dimension_semantics<parallel>], iteration_bounds = array<i64: 1>, scalar_prefetch = 0 : i64, scratch_operands = 0 : i64, tpu.core_type = #tpu.core_type<tc>, window_params = [{transform_indices = @transform_0, window_bounds = array<i64: 8, 8>}, {pipeline_mode = #tpu.pipeline_mode<synchronous>, transform_indices = @transform_1, window_bounds = array<i64: 840, 256>}, {pipeline_mode = #tpu.pipeline_mode<synchronous>, transform_indices = @transform_2, window_bounds = array<i64: 8, 256>}, {transform_indices = @transform_3, window_bounds = array<i64: 8, 128>}]} {
    %c0 = arith.constant 0 : index
    %c0_0 = arith.constant 0 : index
    %0 = vector.load %arg1[%c0, %c0_0] : memref<8x8xf32, #tpu.memory_space<vmem>>, vector<8x8xf32>
    %c0_1 = arith.constant 0 : index
    %c0_2 = arith.constant 0 : index
    %1 = vector.load %arg2[%c0_1, %c0_2] : memref<840x256xf32, #tpu.memory_space<vmem>>, vector<8x256xf32>
    %cst = arith.constant dense<0.000000e+00> : vector<8x256xf32>
    %2 = tpu.matmul %0, %1, %cst {dimension_numbers = #tpu.dot_dimension_numbers<[1], [0], [0], [1], [0, 0, 1, 1], [], []>} : vector<8x8xf32>, vector<8x256xf32>, vector<8x256xf32> -> vector<8x256xf32>
    %c0_3 = arith.constant 0 : index
    %c0_4 = arith.constant 0 : index
    %3 = vector.load %arg3[%c0_3, %c0_4] : memref<8x256xf32, #tpu.memory_space<vmem>>, vector<1x256xf32>
    %4 = vector.broadcast %3 : vector<1x256xf32> to vector<8x256xf32>
    %5 = arith.addf %2, %4 : vector<8x256xf32>
    %cst_5 = arith.constant 0.000000e+00 : f32
    %6 = vector.broadcast %cst_5 : f32 to vector<8x256xf32>
    %7 = arith.maximumf %5, %6 : vector<8x256xf32>
    %c8 = arith.constant 8 : index
    %c0_6 = arith.constant 0 : index
    %8 = vector.load %arg2[%c8, %c0_6] : memref<840x256xf32, #tpu.memory_space<vmem>>, vector<256x256xf32>
    %cst_7 = arith.constant dense<0.000000e+00> : vector<8x256xf32>
    %9 = tpu.matmul %7, %8, %cst_7 {dimension_numbers = #tpu.dot_dimension_numbers<[1], [0], [0], [1], [0, 0, 1, 1], [], []>} : vector<8x256xf32>, vector<256x256xf32>, vector<8x256xf32> -> vector<8x256xf32>
    %c1 = arith.constant 1 : index
    %c0_8 = arith.constant 0 : index
    %10 = vector.load %arg3[%c1, %c0_8] : memref<8x256xf32, #tpu.memory_space<vmem>>, vector<1x256xf32>
    %11 = vector.broadcast %10 : vector<1x256xf32> to vector<8x256xf32>
    %12 = arith.addf %9, %11 : vector<8x256xf32>
    %cst_9 = arith.constant 0.000000e+00 : f32
    %13 = vector.broadcast %cst_9 : f32 to vector<8x256xf32>
    %14 = arith.maximumf %12, %13 : vector<8x256xf32>
    %c264 = arith.constant 264 : index
    %c0_10 = arith.constant 0 : index
    %15 = vector.load %arg2[%c264, %c0_10] : memref<840x256xf32, #tpu.memory_space<vmem>>, vector<256x256xf32>
    %cst_11 = arith.constant dense<0.000000e+00> : vector<8x256xf32>
    %16 = tpu.matmul %14, %15, %cst_11 {dimension_numbers = #tpu.dot_dimension_numbers<[1], [0], [0], [1], [0, 0, 1, 1], [], []>} : vector<8x256xf32>, vector<256x256xf32>, vector<8x256xf32> -> vector<8x256xf32>
    %c2 = arith.constant 2 : index
    %c0_12 = arith.constant 0 : index
    %17 = vector.load %arg3[%c2, %c0_12] : memref<8x256xf32, #tpu.memory_space<vmem>>, vector<1x256xf32>
    %18 = vector.broadcast %17 : vector<1x256xf32> to vector<8x256xf32>
    %19 = arith.addf %16, %18 : vector<8x256xf32>
    %20 = vector.extract_strided_slice %19 {offsets = [0, 0], sizes = [8, 64], strides = [1, 1]} : vector<8x256xf32> to vector<8x64xf32>
    %cst_13 = arith.constant 0.000000e+00 : f32
    %21 = vector.broadcast %cst_13 : f32 to vector<8x64xf32>
    %22 = arith.maximumf %20, %21 : vector<8x64xf32>
    %23 = math.absf %20 : vector<8x64xf32>
    %cst_14 = arith.constant 0.000000e+00 : f32
    %24 = vector.broadcast %cst_14 : f32 to vector<8x64xf32>
    %25 = arith.subf %24, %23 : vector<8x64xf32>
    %26 = math.exp %25 : vector<8x64xf32>
    %27 = math.log1p %26 : vector<8x64xf32>
    %28 = arith.addf %22, %27 : vector<8x64xf32>
    %cst_15 = arith.constant dense<0.000000e+00> : vector<8xf32>
    %29 = vector.multi_reduction <add>, %28, %cst_15 [1] : vector<8x64xf32> to vector<8xf32>
    %30 = vector.shape_cast %29 : vector<8xf32> to vector<8x1xf32>
    %cst_16 = arith.constant 1.562500e-02 : f32
    %31 = vector.broadcast %cst_16 : f32 to vector<8x1xf32>
    %32 = arith.mulf %30, %31 : vector<8x1xf32>
    %33 = vector.broadcast %32 : vector<8x1xf32> to vector<8x64xf32>
    %34 = arith.divf %28, %33 : vector<8x64xf32>
    %c520 = arith.constant 520 : index
    %c0_17 = arith.constant 0 : index
    %35 = vector.load %arg2[%c520, %c0_17] : memref<840x256xf32, #tpu.memory_space<vmem>>, vector<64x256xf32>
    %cst_18 = arith.constant dense<0.000000e+00> : vector<8x256xf32>
    %36 = tpu.matmul %34, %35, %cst_18 {dimension_numbers = #tpu.dot_dimension_numbers<[1], [0], [0], [1], [0, 0, 1, 1], [], []>} : vector<8x64xf32>, vector<64x256xf32>, vector<8x256xf32> -> vector<8x256xf32>
    %c3 = arith.constant 3 : index
    %c0_19 = arith.constant 0 : index
    %37 = vector.load %arg3[%c3, %c0_19] : memref<8x256xf32, #tpu.memory_space<vmem>>, vector<1x256xf32>
    %38 = vector.broadcast %37 : vector<1x256xf32> to vector<8x256xf32>
    %39 = arith.addf %36, %38 : vector<8x256xf32>
    %cst_20 = arith.constant 0.000000e+00 : f32
    %40 = vector.broadcast %cst_20 : f32 to vector<8x256xf32>
    %41 = arith.maximumf %39, %40 : vector<8x256xf32>
    %c584 = arith.constant 584 : index
    %c0_21 = arith.constant 0 : index
    %42 = vector.load %arg2[%c584, %c0_21] : memref<840x256xf32, #tpu.memory_space<vmem>>, vector<256x256xf32>
    %cst_22 = arith.constant dense<0.000000e+00> : vector<8x256xf32>
    %43 = tpu.matmul %41, %42, %cst_22 {dimension_numbers = #tpu.dot_dimension_numbers<[1], [0], [0], [1], [0, 0, 1, 1], [], []>} : vector<8x256xf32>, vector<256x256xf32>, vector<8x256xf32> -> vector<8x256xf32>
    %c4 = arith.constant 4 : index
    %c0_23 = arith.constant 0 : index
    %44 = vector.load %arg3[%c4, %c0_23] : memref<8x256xf32, #tpu.memory_space<vmem>>, vector<1x256xf32>
    %45 = vector.broadcast %44 : vector<1x256xf32> to vector<8x256xf32>
    %46 = arith.addf %43, %45 : vector<8x256xf32>
    %cst_24 = arith.constant 0.000000e+00 : f32
    %47 = vector.broadcast %cst_24 : f32 to vector<8x256xf32>
    %48 = arith.maximumf %46, %47 : vector<8x256xf32>
    %c5 = arith.constant 5 : index
    %c0_25 = arith.constant 0 : index
    %49 = vector.load %arg3[%c5, %c0_25] : memref<8x256xf32, #tpu.memory_space<vmem>>, vector<1x256xf32>
    %50 = vector.broadcast %49 : vector<1x256xf32> to vector<8x256xf32>
    %51 = arith.mulf %48, %50 : vector<8x256xf32>
    %cst_26 = arith.constant dense<0.000000e+00> : vector<8xf32>
    %52 = vector.multi_reduction <add>, %51, %cst_26 [1] : vector<8x256xf32> to vector<8xf32>
    %53 = vector.shape_cast %52 : vector<8xf32> to vector<8x1xf32>
    %c6 = arith.constant 6 : index
    %c0_27 = arith.constant 0 : index
    %54 = vector.load %arg3[%c6, %c0_27] : memref<8x256xf32, #tpu.memory_space<vmem>>, vector<1x1xf32>
    %55 = vector.broadcast %54 : vector<1x1xf32> to vector<8x1xf32>
    %56 = arith.addf %53, %55 : vector<8x1xf32>
    %57 = vector.shape_cast %56 : vector<8x1xf32> to vector<8x1xf32>
    %58 = vector.broadcast %57 : vector<8x1xf32> to vector<8x64xf32>
    %59 = tpu.concatenate %34, %58 in 1 : vector<8x64xf32>, vector<8x64xf32> -> vector<8x128xf32>
    %c0_28 = arith.constant 0 : index
    %c0_29 = arith.constant 0 : index
    %60 = vector.load %arg4[%c0_28, %c0_29] : memref<8x128xf32, #tpu.memory_space<vmem>>, vector<8x128xf32>
    tpu.vector_store %arg4[%c0_28, %c0_29], %59 {strides = array<i32>} : memref<8x128xf32, #tpu.memory_space<vmem>>, vector<8x128xf32>,
    return
  }
  func.func @transform_0(%arg0: i32) -> (i32, i32) {
    %c0_i32 = arith.constant 0 : i32
    %c0_i32_0 = arith.constant 0 : i32
    return %arg0, %c0_i32 : i32, i32
  }
  func.func @transform_1(%arg0: i32) -> (i32, i32) {
    %c0_i32 = arith.constant 0 : i32
    %c0_i32_0 = arith.constant 0 : i32
    %c0_i32_1 = arith.constant 0 : i32
    return %c0_i32, %c0_i32_0 : i32, i32
  }
  func.func @transform_2(%arg0: i32) -> (i32, i32) {
    %c0_i32 = arith.constant 0 : i32
    %c0_i32_0 = arith.constant 0 : i32
    %c0_i32_1 = arith.constant 0 : i32
    return %c0_i32, %c0_i32_0 : i32, i32
  }
  func.func @transform_3(%arg0: i32) -> (i32, i32) {
    %c0_i32 = arith.constant 0 : i32
    %c0_i32_0 = arith.constant 0 : i32
    return %arg0, %c0_i32 : i32, i32
  }
}

</mosaic_0001>

<bundles_post_ra>
// kernel: dftvae_norm_forward.1
= control target key start
LH: loop header
LB: loop body
LE: loop exit
PB: predicated region body
PF: predicated region fallthrough
CT: control target
= control target key end

     0   :  { %8 = vsyncpa [#allocation3], 0  ;;  %s738_s0 = inlined_call_operand.vmem [shape: f32[8,8], index: 0, kind: input, shape index: {}]   ;;  %s739_s1 = inlined_call_operand.hbm [shape: f32[840,256], index: 1, kind: input, shape index: {}]   ;;  %s740_s2 = inlined_call_operand.hbm [shape: f32[8,256], index: 2, kind: input, shape index: {}]   ;;  %s741_s3 = inlined_call_operand.vmem [shape: f32[8,128], index: 3, kind: output, shape index: {}]  }
   0x1   :  { %s16_s14 = sshll.u32 %s739_s1, 4  ;;  %s17_s14 = int_to_ptr.hbm [resolvable:$true] %s16_s14 }
   0x2   :  { %9 = vsyncpa [#allocation5], 0  ;;  %s681_s15 = smov [#allocation2]   ;;  %s30_s19 = sshll.u32 %s740_s2, 4  ;;  %s31_s19 = int_to_ptr.hbm [resolvable:$true] %s30_s19 }
   0x3   :  { %s18_s16 = sshll.u32 %s681_s15, 4  ;;  %s682_s20 = smov 256   ;;  %s19_s16 = int_to_ptr.vmem [resolvable:$true] %s18_s16 }
   0x4   :  { %s683_s21 = smov 16   ;;  %s684_s22 = smov [#allocation4]  }
   0x5   :  { %24 = dma.hbm_to_vmem [thread:$0]  %s17_s14, 26880, %s19_s16, [#allocation3], %s682_s20, %s682_s20, %s683_s21  }
   0x6   :  { %s32_s23 = sshll.u32 %s684_s22, 4  ;;  %s33_s23 = int_to_ptr.vmem [resolvable:$true] %s32_s23 }
   0x7   :  { %35 = dma.hbm_to_vmem [thread:$0]  %s31_s19, 256, %s33_s23, [#allocation5]  }
   0x8   :  { %677 = dma.done.wait [#allocation3], 26880  }
   0x9   :  { %678 = vsyncadd [#allocation3], 4294940416 }
   0xa   :  { %679 = dma.done.wait [#allocation5], 256  }
   0xb   :  { %680 = vsyncadd [#allocation5], 4294967040  ;;  %vm53_vm0 = vcmask 64512   ;;  %v45_v0 = vld [vmem:[#allocation2] sm:$0xff]  ;;  %v46_v2 = vld [vmem:[#allocation2 + $0x8] sm:$0xff]  ;;  %vm344_vm2 = vcmask 523264  }
   0xc   :  { %v44_v1 = vld [vmem:[%s738_s0] sm:$0xff]  ;;  %72 = vmatpush.msra.mxu0 %v45_v0  ;;  %92 = vmatpush.msra.mxu1 %v46_v2  ;;  %v130_v4 = vld [vmem:[#allocation2 + $0x108] sm:$0xff]  ;;  %v127_v5 = vld [vmem:[#allocation2 + $0xf0] sm:$0xff] }
   0xd   :  { %v129_v3 = vld [vmem:[#allocation2 + $0x100] sm:$0xff]  ;;  %612 = vmatmul.msk.f32.vlgmr.msra.gmra.mxu0 %vm53_vm0, %v44_v1  ;;  %613 = vmatmul.msk.f32.vlgmr.msra.gmra.mxu1 %vm53_vm0, %v44_v1  ;;  %v128_v7 = vld [vmem:[#allocation2 + $0xf8] sm:$0xff]  ;;  %v162_v8 = vld [vmem:[#allocation2 + $0x208] sm:$0xff] }
   0xe   :  { %v161_v6 = vld [vmem:[#allocation2 + $0x200] sm:$0xff]  ;;  %170 = vmatpush.msra.mxu2 %v129_v3  ;;  %210 = vmatpush.msrb.mxu0 %v130_v4  ;;  %v159_v9 = vld [vmem:[#allocation2 + $0x1f0] sm:$0xff]  ;;  %v126_v11 = vld [vmem:[#allocation2 + $0xe8] sm:$0xff] }
   0xf   :  { %190 = vmatpush.msra.mxu3 %v161_v6  ;;  %230 = vmatpush.msrb.mxu1 %v162_v8  ;;  %v125_v10 = vld [vmem:[#allocation2 + $0xe0] sm:$0xff]  ;;  %v160_v12 = vld [vmem:[#allocation2 + $0x1f8] sm:$0xff]  ;;  %v158_v14 = vld [vmem:[#allocation2 + $0x1e8] sm:$0xff] }
  0x10   :  { %171 = vmatpush.msra.mxu2 %v127_v5  ;;  %211 = vmatpush.msrb.mxu0 %v128_v7  ;;  %v157_v13 = vld [vmem:[#allocation2 + $0x1e0] sm:$0xff]  ;;  %v123_v15 = vld [vmem:[#allocation2 + $0xd0] sm:$0xff]  ;;  %v124_v16 = vld [vmem:[#allocation2 + $0xd8] sm:$0xff] }
  0x11   :  { %191 = vmatpush.msra.mxu3 %v159_v9  ;;  %231 = vmatpush.msrb.mxu1 %v160_v12  ;;  %v155_v17 = vld [vmem:[#allocation2 + $0x1d0] sm:$0xff]  ;;  %v156_v18 = vld [vmem:[#allocation2 + $0x1d8] sm:$0xff]  ;;  %v121_v19 = vld [vmem:[#allocation2 + $0xc0] sm:$0xff] }
  0x12   :  { %172 = vmatpush.msra.mxu2 %v125_v10  ;;  %212 = vmatpush.msrb.mxu0 %v126_v11  ;;  %v122_v20 = vld [vmem:[#allocation2 + $0xc8] sm:$0xff]  ;;  %v153_v21 = vld [vmem:[#allocation2 + $0x1c0] sm:$0xff]  ;;  %v119_v23 = vld [vmem:[#allocation2 + $0xb0] sm:$0xff] }
  0x13   :  { %192 = vmatpush.msra.mxu3 %v157_v13  ;;  %232 = vmatpush.msrb.mxu1 %v158_v14  ;;  %v154_v22 = vld [vmem:[#allocation2 + $0x1c8] sm:$0xff]  ;;  %v120_v24 = vld [vmem:[#allocation2 + $0xb8] sm:$0xff]  ;;  %v151_v25 = vld [vmem:[#allocation2 + $0x1b0] sm:$0xff] }
  0x14   :  { %173 = vmatpush.msra.mxu2 %v123_v15  ;;  %213 = vmatpush.msrb.mxu0 %v124_v16  ;;  %v152_v26 = vld [vmem:[#allocation2 + $0x1b8] sm:$0xff]  ;;  %v117_v27 = vld [vmem:[#allocation2 + $0xa0] sm:$0xff]  ;;  %v118_v28 = vld [vmem:[#allocation2 + $0xa8] sm:$0xff] }
  0x15   :  { %193 = vmatpush.msra.mxu3 %v155_v17  ;;  %233 = vmatpush.msrb.mxu1 %v156_v18  ;;  %v149_v29 = vld [vmem:[#allocation2 + $0x1a0] sm:$0xff]  ;;  %v150_v30 = vld [vmem:[#allocation2 + $0x1a8] sm:$0xff]  ;;  %v115_v31 = vld [vmem:[#allocation2 + $0x90] sm:$0xff] }
  0x16   :  { %174 = vmatpush.msra.mxu2 %v121_v19  ;;  %214 = vmatpush.msrb.mxu0 %v122_v20  ;;  %v116_v32 = vld [vmem:[#allocation2 + $0x98] sm:$0xff]  ;;  %v147_v33 = vld [vmem:[#allocation2 + $0x190] sm:$0xff]  ;;  %v113_v35 = vld [vmem:[#allocation2 + $0x80] sm:$0xff] }
  0x17   :  { %194 = vmatpush.msra.mxu3 %v153_v21  ;;  %234 = vmatpush.msrb.mxu1 %v154_v22  ;;  %v148_v34 = vld [vmem:[#allocation2 + $0x198] sm:$0xff]  ;;  %v114_v36 = vld [vmem:[#allocation2 + $0x88] sm:$0xff]  ;;  %v145_v37 = vld [vmem:[#allocation2 + $0x180] sm:$0xff] }
  0x18   :  { %175 = vmatpush.msra.mxu2 %v119_v23  ;;  %215 = vmatpush.msrb.mxu0 %v120_v24  ;;  %v146_v38 = vld [vmem:[#allocation2 + $0x188] sm:$0xff]  ;;  %v111_v39 = vld [vmem:[#allocation2 + $0x70] sm:$0xff]  ;;  %v112_v40 = vld [vmem:[#allocation2 + $0x78] sm:$0xff] }
  0x19   :  { %195 = vmatpush.msra.mxu3 %v151_v25  ;;  %235 = vmatpush.msrb.mxu1 %v152_v26  ;;  %v143_v41 = vld [vmem:[#allocation2 + $0x170] sm:$0xff]  ;;  %v144_v42 = vld [vmem:[#allocation2 + $0x178] sm:$0xff]  ;;  %v109_v43 = vld [vmem:[#allocation2 + $0x60] sm:$0xff] }
  0x1a   :  { %176 = vmatpush.msra.mxu2 %v117_v27  ;;  %216 = vmatpush.msrb.mxu0 %v118_v28  ;;  %v110_v44 = vld [vmem:[#allocation2 + $0x68] sm:$0xff]  ;;  %v141_v45 = vld [vmem:[#allocation2 + $0x160] sm:$0xff]  ;;  %v107_v47 = vld [vmem:[#allocation2 + $0x50] sm:$0xff] }
  0x1b   :  { %196 = vmatpush.msra.mxu3 %v149_v29  ;;  %236 = vmatpush.msrb.mxu1 %v150_v30  ;;  %v142_v46 = vld [vmem:[#allocation2 + $0x168] sm:$0xff]  ;;  %v108_v48 = vld [vmem:[#allocation2 + $0x58] sm:$0xff]  ;;  %v139_v49 = vld [vmem:[#allocation2 + $0x150] sm:$0xff] }
  0x1c   :  { %177 = vmatpush.msra.mxu2 %v115_v31  ;;  %217 = vmatpush.msrb.mxu0 %v116_v32  ;;  %v140_v50 = vld [vmem:[#allocation2 + $0x158] sm:$0xff]  ;;  %v105_v51 = vld [vmem:[#allocation2 + $0x40] sm:$0xff]  ;;  %v106_v52 = vld [vmem:[#allocation2 + $0x48] sm:$0xff] }
  0x1d   :  { %197 = vmatpush.msra.mxu3 %v147_v33  ;;  %237 = vmatpush.msrb.mxu1 %v148_v34  ;;  %v103_v53 = vld [vmem:[#allocation2 + $0x30] sm:$0xff]  ;;  %v137_v54 = vld [vmem:[#allocation2 + $0x140] sm:$0xff]  ;;  %v104_v55 = vld [vmem:[#allocation2 + $0x38] sm:$0xff] }
  0x1e   :  { %178 = vmatpush.msra.mxu2 %v113_v35  ;;  %218 = vmatpush.msrb.mxu0 %v114_v36  ;;  %v138_v56 = vld [vmem:[#allocation2 + $0x148] sm:$0xff]  ;;  %v101_v57 = vld [vmem:[#allocation2 + $0x20] sm:$0xff]  ;;  %v135_v58 = vld [vmem:[#allocation2 + $0x130] sm:$0xff] }
  0x1f   :  { %198 = vmatpush.msra.mxu3 %v145_v37  ;;  %238 = vmatpush.msrb.mxu1 %v146_v38  ;;  %v102_v59 = vld [vmem:[#allocation2 + $0x28] sm:$0xff]  ;;  %v136_v60 = vld [vmem:[#allocation2 + $0x138] sm:$0xff]  ;;  %v99_v61 = vld [vmem:[#allocation2 + $0x10] sm:$0xff] }
  0x20   :  { %179 = vmatpush.msra.mxu2 %v111_v39  ;;  %219 = vmatpush.msrb.mxu0 %v112_v40  ;;  %v133_v62 = vld [vmem:[#allocation2 + $0x120] sm:$0xff]  ;;  %v100_v63 = vld [vmem:[#allocation2 + $0x18] sm:$0xff]  ;;  %v134_v0 = vld [vmem:[#allocation2 + $0x128] sm:$0xff] }
  0x21   :  { %199 = vmatpush.msra.mxu3 %v143_v41  ;;  %239 = vmatpush.msrb.mxu1 %v144_v42  ;;  %v131_v1 = vld [vmem:[#allocation2 + $0x110] sm:$0xff]  ;;  %v132_v2 = vld [vmem:[#allocation2 + $0x118] sm:$0xff]  ;;  %v283_v3 = vld [vmem:[#allocation2 + $0x400] sm:$0xff] }
  0x22   :  { %180 = vmatpush.msra.mxu2 %v109_v43  ;;  %220 = vmatpush.msrb.mxu0 %v110_v44  ;;  %v282_v4 = vld [vmem:[#allocation2 + $0x3f0] sm:$0xff]  ;;  %v267_v5 = vld [vmem:[#allocation2 + $0x300] sm:$0xff] }
  0x23   :  { %200 = vmatpush.msra.mxu3 %v141_v45  ;;  %240 = vmatpush.msrb.mxu1 %v142_v46  ;;  %v266_v6 = vld [vmem:[#allocation2 + $0x2f0] sm:$0xff]  ;;  %v281_v7 = vld [vmem:[#allocation2 + $0x3e0] sm:$0xff] }
  0x24   :  { %181 = vmatpush.msra.mxu2 %v107_v47  ;;  %221 = vmatpush.msrb.mxu0 %v108_v48  ;;  %v265_v8 = vld [vmem:[#allocation2 + $0x2e0] sm:$0xff]  ;;  %v280_v9 = vld [vmem:[#allocation2 + $0x3d0] sm:$0xff] }
  0x25   :  { %201 = vmatpush.msra.mxu3 %v139_v49  ;;  %241 = vmatpush.msrb.mxu1 %v140_v50  ;;  %v264_v10 = vld [vmem:[#allocation2 + $0x2d0] sm:$0xff]  ;;  %v279_v11 = vld [vmem:[#allocation2 + $0x3c0] sm:$0xff] }
  0x26   :  { %182 = vmatpush.msra.mxu2 %v105_v51  ;;  %222 = vmatpush.msrb.mxu0 %v106_v52  ;;  %v263_v12 = vld [vmem:[#allocation2 + $0x2c0] sm:$0xff]  ;;  %v278_v13 = vld [vmem:[#allocation2 + $0x3b0] sm:$0xff] }
  0x27   :  { %202 = vmatpush.msra.mxu3 %v137_v54  ;;  %242 = vmatpush.msrb.mxu1 %v138_v56  ;;  %v262_v14 = vld [vmem:[#allocation2 + $0x2b0] sm:$0xff]  ;;  %v277_v15 = vld [vmem:[#allocation2 + $0x3a0] sm:$0xff] }
  0x28   :  { %183 = vmatpush.msra.mxu2 %v103_v53  ;;  %223 = vmatpush.msrb.mxu0 %v104_v55  ;;  %v261_v16 = vld [vmem:[#allocation2 + $0x2a0] sm:$0xff]  ;;  %v276_v17 = vld [vmem:[#allocation2 + $0x390] sm:$0xff] }
  0x29   :  { %203 = vmatpush.msra.mxu3 %v135_v58  ;;  %243 = vmatpush.msrb.mxu1 %v136_v60  ;;  %v260_v18 = vld [vmem:[#allocation2 + $0x290] sm:$0xff]  ;;  %v275_v19 = vld [vmem:[#allocation2 + $0x380] sm:$0xff] }
  0x2a   :  { %184 = vmatpush.msra.mxu2 %v101_v57  ;;  %224 = vmatpush.msrb.mxu0 %v102_v59  ;;  %v259_v20 = vld [vmem:[#allocation2 + $0x280] sm:$0xff]  ;;  %v274_v21 = vld [vmem:[#allocation2 + $0x370] sm:$0xff] }
  0x2b   :  { %204 = vmatpush.msra.mxu3 %v133_v62  ;;  %244 = vmatpush.msrb.mxu1 %v134_v0  ;;  %v273_v22 = vld [vmem:[#allocation2 + $0x360] sm:$0xff]  ;;  %v47_v23 = vld [vmem:[#allocation4] ss:$8 sm:$0x3] }
  0x2c   :  { %185 = vmatpush.msra.mxu2 %v99_v61  ;;  %225 = vmatpush.msrb.mxu0 %v100_v63  ;;  %v272_v24 = vld [vmem:[#allocation2 + $0x350] sm:$0xff]  ;;  %v49_v25 = vperm.slane %v47_v23, 0  ;;  %v50_v26 = vperm.slane %v47_v23, 1  ;;  %v271_v34 = vld [vmem:[#allocation2 + $0x340] sm:$0xff]  ;;  %v371_v23 = vld [vmem:[#allocation2 + $0x448] sm:$0xff] }
  0x2d   :  { %205 = vmatpush.msra.mxu3 %v131_v1  ;;  %245 = vmatpush.msrb.mxu1 %v132_v2  ;;  %v258_v33 = vld [vmem:[#allocation2 + $0x270] sm:$0xff]  ;;  %v257_v35 = vld [vmem:[#allocation2 + $0x260] sm:$0xff] }
  0x2e   :  { %289 = vmatpush.msrb.mxu2 %v267_v5  ;;  %v270_v36 = vld [vmem:[#allocation2 + $0x330] sm:$0xff]  ;;  %v269_v38 = vld [vmem:[#allocation2 + $0x320] sm:$0xff] }
  0x2f   :  { %309 = vmatpush.msrb.mxu3 %v283_v3  ;;  %v256_v37 = vld [vmem:[#allocation2 + $0x250] sm:$0xff]  ;;  %v255_v39 = vld [vmem:[#allocation2 + $0x240] sm:$0xff] }
  0x30   :  { %290 = vmatpush.msrb.mxu2 %v266_v6  ;;  %v268_v40 = vld [vmem:[#allocation2 + $0x310] sm:$0xff]  ;;  %v253_v42 = vld [vmem:[#allocation2 + $0x220] sm:$0xff] }
  0x31   :  { %310 = vmatpush.msrb.mxu3 %v282_v4  ;;  %v254_v41 = vld [vmem:[#allocation2 + $0x230] sm:$0xff] }
  0x32   :  { %291 = vmatpush.msrb.mxu2 %v265_v8  ;;  %v252_v43 = vld [vmem:[#allocation2 + $0x210] sm:$0xff] }
  0x33   :  { %311 = vmatpush.msrb.mxu3 %v281_v7  ;;  %v164_v44 = vld [vmem:[#allocation4 + $0x1] ss:$8 sm:$0x3]  ;;  %v285_v57 = vld [vmem:[#allocation4 + $0x2] ss:$8 sm:$0x3] }
  0x34   :  { %292 = vmatpush.msrb.mxu2 %v264_v10  ;;  %v167_v45 = vperm.slane %v164_v44, 1  ;;  %v166_v50 = vperm.slane %v164_v44, 0  ;;  %v287_v58 = vperm.slane %v285_v57, 0  ;;  %v457_v44 = vld [vmem:[#allocation2 + $0x558] sm:$0xff] }
  0x35   :  { %312 = vmatpush.msrb.mxu3 %v280_v9 }
  0x36   :  { %293 = vmatpush.msrb.mxu2 %v263_v12 }
  0x37   :  { %313 = vmatpush.msrb.mxu3 %v279_v11 }
  0x38   :  { %294 = vmatpush.msrb.mxu2 %v262_v14  ;;  %v378_v14 = vld [vmem:[#allocation2 + $0x480] sm:$0xff] }
  0x39   :  { %314 = vmatpush.msrb.mxu3 %v278_v13  ;;  %398 = vmatpush.msra.mxu0 %v378_v14 }
  0x3a   :  { %295 = vmatpush.msrb.mxu2 %v261_v16  ;;  %v376_v16 = vld [vmem:[#allocation2 + $0x470] sm:$0xff] }
  0x3b   :  { %315 = vmatpush.msrb.mxu3 %v277_v15  ;;  %v379_v15 = vld [vmem:[#allocation2 + $0x488] sm:$0xff]  ;;  %399 = vmatpush.msra.mxu0 %v376_v16  ;;  %v472_v16 = vld [vmem:[#allocation2 + $0x5d0] sm:$0xff] }
  0x3c   :  { %296 = vmatpush.msrb.mxu2 %v260_v18  ;;  %418 = vmatpush.msra.mxu1 %v379_v15  ;;  %v374_v18 = vld [vmem:[#allocation2 + $0x460] sm:$0xff]  ;;  %v440_v15 = vld [vmem:[#allocation2 + $0x4d0] sm:$0xff] }
  0x3d   :  { %316 = vmatpush.msrb.mxu3 %v276_v17  ;;  %v377_v17 = vld [vmem:[#allocation2 + $0x478] sm:$0xff]  ;;  %400 = vmatpush.msra.mxu0 %v374_v18 }
  0x3e   :  { %297 = vmatpush.msrb.mxu2 %v259_v20  ;;  %419 = vmatpush.msra.mxu1 %v377_v17  ;;  %v372_v20 = vld [vmem:[#allocation2 + $0x450] sm:$0xff]  ;;  %v441_v17 = vld [vmem:[#allocation2 + $0x4d8] sm:$0xff] }
  0x3f   :  { %317 = vmatpush.msrb.mxu3 %v275_v19  ;;  %v375_v19 = vld [vmem:[#allocation2 + $0x468] sm:$0xff]  ;;  %401 = vmatpush.msra.mxu0 %v372_v20  ;;  %v473_v18 = vld [vmem:[#allocation2 + $0x5d8] sm:$0xff]  ;;  %v438_v20 = vld [vmem:[#allocation2 + $0x4c0] sm:$0xff] }
  0x40   :  { %298 = vmatpush.msrb.mxu2 %v258_v33  ;;  %420 = vmatpush.msra.mxu1 %v375_v19  ;;  %v495_v33 = vld [vmem:[#allocation2 + $0x688] sm:$0xff] }
  0x41   :  { %318 = vmatpush.msrb.mxu3 %v274_v21  ;;  %v373_v21 = vld [vmem:[#allocation2 + $0x458] sm:$0xff] }
  0x42   :  { %299 = vmatpush.msrb.mxu2 %v257_v35  ;;  %421 = vmatpush.msra.mxu1 %v373_v21  ;;  %v492_v35 = vld [vmem:[#allocation2 + $0x670] sm:$0xff]  ;;  %v470_v21 = vld [vmem:[#allocation2 + $0x5c0] sm:$0xff] }
  0x43   :  { %319 = vmatpush.msrb.mxu3 %v273_v22  ;;  %v370_v22 = vld [vmem:[#allocation2 + $0x440] sm:$0xff] }
  0x44   :  { %300 = vmatpush.msrb.mxu2 %v256_v37  ;;  %402 = vmatpush.msra.mxu0 %v370_v22  ;;  %v493_v37 = vld [vmem:[#allocation2 + $0x678] sm:$0xff] }
  0x45   :  { %320 = vmatpush.msrb.mxu3 %v272_v24  ;;  %422 = vmatpush.msra.mxu1 %v371_v23  ;;  %v368_v24 = vld [vmem:[#allocation2 + $0x430] sm:$0xff]  ;;  %v439_v23 = vld [vmem:[#allocation2 + $0x4c8] sm:$0xff] }
  0x46   :  { %301 = vmatpush.msrb.mxu2 %v255_v39  ;;  %403 = vmatpush.msra.mxu0 %v368_v24  ;;  %v490_v39 = vld [vmem:[#allocation2 + $0x660] sm:$0xff]  ;;  %v471_v24 = vld [vmem:[#allocation2 + $0x5c8] sm:$0xff] }
  0x47   :  { %321 = vmatpush.msrb.mxu3 %v271_v34  ;;  %v460_v34 = vld [vmem:[#allocation2 + $0x570] sm:$0xff] }
  0x48   :  { %302 = vmatpush.msrb.mxu2 %v254_v41  ;;  %v491_v41 = vld [vmem:[#allocation2 + $0x668] sm:$0xff] }
  0x49   :  { %322 = vmatpush.msrb.mxu3 %v270_v36  ;;  %v461_v36 = vld [vmem:[#allocation2 + $0x578] sm:$0xff] }
  0x4a   :  { %303 = vmatpush.msrb.mxu2 %v253_v42  ;;  %v456_v42 = vld [vmem:[#allocation2 + $0x550] sm:$0xff] }
  0x4b   :  { %323 = vmatpush.msrb.mxu3 %v269_v38  ;;  %v458_v38 = vld [vmem:[#allocation2 + $0x560] sm:$0xff] }
  0x4c   :  { %304 = vmatpush.msrb.mxu2 %v252_v43  ;;  %v488_v43 = vld [vmem:[#allocation2 + $0x650] sm:$0xff] }
  0x4d   :  { %324 = vmatpush.msrb.mxu3 %v268_v40  ;;  %v459_v40 = vld [vmem:[#allocation2 + $0x568] sm:$0xff] }
  0x8a   :  { %v74_v27 = vpop.f32.mrf.mxu0  ;;  %v94_v28 = vpop.f32.mrf.mxu1 }
  0x8b   :  { %v75_v29 = vadd.f32 %v74_v27, %v49_v25  ;;  %v95_v30 = vadd.f32 %v94_v28, %v50_v26  ;;  %v369_v25 = vld [vmem:[#allocation2 + $0x438] sm:$0xff]  ;;  %v366_v26 = vld [vmem:[#allocation2 + $0x420] sm:$0xff]  ;;  %v367_v27 = vld [vmem:[#allocation2 + $0x428] sm:$0xff] }
  0x8c   :  { %423 = vmatpush.msra.mxu1 %v369_v25  ;;  %v364_v28 = vld [vmem:[#allocation2 + $0x410] sm:$0xff]  ;;  %404 = vmatpush.msra.mxu0 %v366_v26 }
  0x8d   :  { %v97_v31 = vmax.f32 %v75_v29, 0.0  ;;  %v98_v32 = vmax.f32 %v95_v30, 0.0  ;;  %v365_v29 = vld [vmem:[#allocation2 + $0x418] sm:$0xff]  ;;  %v462_v30 = vld [vmem:[#allocation2 + $0x580] sm:$0xff] }
  0x8e   :  { %424 = vmatpush.msra.mxu1 %v367_v27  ;;  %405 = vmatpush.msra.mxu0 %v364_v28 }
  0x8f   :  { %186 = vmatmul.f32.vlgmr.msra.gmra.mxu2 %v97_v31  ;;  %226 = vmatmul.f32.vlgmr.msrb.gmra.mxu0 %v97_v31  ;;  %v494_v31 = vld [vmem:[#allocation2 + $0x680] sm:$0xff] }
  0x90   :  { %206 = vmatmul.f32.vlgmr.msra.gmra.mxu3 %v98_v32  ;;  %246 = vmatmul.f32.vlgmr.msrb.gmra.mxu1 %v98_v32  ;;  %v463_v32 = vld [vmem:[#allocation2 + $0x588] sm:$0xff] }
  0x91   :  { %425 = vmatpush.msra.mxu1 %v365_v29  ;;  %503 = vmatpush.msrb.mxu0 %v462_v30 }
  0x92   :  { %543 = vmatpush.msra.mxu2 %v463_v32  ;;  %563 = vmatpush.msra.mxu3 %v495_v33  ;;  %v436_v32 = vld [vmem:[#allocation2 + $0x4b0] sm:$0xff] }
  0x93   :  { %523 = vmatpush.msrb.mxu1 %v494_v31  ;;  %504 = vmatpush.msrb.mxu0 %v460_v34  ;;  %v468_v33 = vld [vmem:[#allocation2 + $0x5b0] sm:$0xff]  ;;  %v437_v34 = vld [vmem:[#allocation2 + $0x4b8] sm:$0xff] }
  0x94   :  { %544 = vmatpush.msra.mxu2 %v461_v36  ;;  %564 = vmatpush.msra.mxu3 %v493_v37  ;;  %v434_v36 = vld [vmem:[#allocation2 + $0x4a0] sm:$0xff] }
  0x95   :  { %524 = vmatpush.msrb.mxu1 %v492_v35  ;;  %505 = vmatpush.msrb.mxu0 %v458_v38  ;;  %v469_v35 = vld [vmem:[#allocation2 + $0x5b8] sm:$0xff]  ;;  %v466_v37 = vld [vmem:[#allocation2 + $0x5a0] sm:$0xff]  ;;  %v435_v38 = vld [vmem:[#allocation2 + $0x4a8] sm:$0xff] }
  0x96   :  { %545 = vmatpush.msra.mxu2 %v459_v40  ;;  %565 = vmatpush.msra.mxu3 %v491_v41  ;;  %v464_v40 = vld [vmem:[#allocation2 + $0x590] sm:$0xff]  ;;  %v433_v41 = vld [vmem:[#allocation2 + $0x498] sm:$0xff] }
  0x97   :  { %525 = vmatpush.msrb.mxu1 %v490_v39  ;;  %506 = vmatpush.msrb.mxu0 %v456_v42  ;;  %v432_v39 = vld [vmem:[#allocation2 + $0x490] sm:$0xff]  ;;  %v465_v42 = vld [vmem:[#allocation2 + $0x598] sm:$0xff] }
  0x98   :  { %546 = vmatpush.msra.mxu2 %v457_v44 }
  0x99   :  { %526 = vmatpush.msrb.mxu1 %v488_v43  ;;  %v381_v43 = vld [vmem:[#allocation4 + $0x3] ss:$8 sm:$0x3] }
  0x9a   :  { %v383_v44 = vperm.slane %v381_v43, 0 }
 0x10c   :  { %v227_v46 = vpop.f32.mrf.mxu0 }
 0x10d   :  { %v228_v47 = vadd.f32 %v227_v46, %v167_v45  ;;  %v247_v48 = vpop.f32.mrf.mxu1  ;;  %v489_v45 = vld [vmem:[#allocation2 + $0x658] sm:$0xff]  ;;  %v454_v46 = vld [vmem:[#allocation2 + $0x540] sm:$0xff] }
 0x10e   :  { %566 = vmatpush.msra.mxu3 %v489_v45  ;;  %507 = vmatpush.msrb.mxu0 %v454_v46  ;;  %v384_v45 = vperm.slane %v381_v43, 1 }
 0x10f   :  { %v248_v49 = vadd.f32 %v247_v48, %v228_v47  ;;  %v486_v47 = vld [vmem:[#allocation2 + $0x640] sm:$0xff]  ;;  %v455_v48 = vld [vmem:[#allocation2 + $0x548] sm:$0xff] }
 0x110   :  { %527 = vmatpush.msrb.mxu1 %v486_v47  ;;  %547 = vmatpush.msra.mxu2 %v455_v48 }
 0x111   :  { %v251_v51 = vmax.f32 %v248_v49, 0.0  ;;  %v487_v49 = vld [vmem:[#allocation2 + $0x648] sm:$0xff] }
 0x112   :  { %v187_v52 = vpop.f32.mrf.mxu2  ;;  %567 = vmatpush.msra.mxu3 %v487_v49 }
 0x113   :  { %v188_v53 = vadd.f32 %v187_v52, %v166_v50  ;;  %325 = vmatmul.f32.vlgmr.msrb.gmra.mxu3 %v251_v51  ;;  %v207_v54 = vpop.f32.mrf.mxu3  ;;  %v452_v50 = vld [vmem:[#allocation2 + $0x530] sm:$0xff]  ;;  %v453_v52 = vld [vmem:[#allocation2 + $0x538] sm:$0xff] }
 0x114   :  { %v484_v51 = vld [vmem:[#allocation2 + $0x630] sm:$0xff]  ;;  %508 = vmatpush.msrb.mxu0 %v452_v50  ;;  %548 = vmatpush.msra.mxu2 %v453_v52 }
 0x115   :  { %v208_v55 = vadd.f32 %v207_v54, %v188_v53  ;;  %v485_v53 = vld [vmem:[#allocation2 + $0x638] sm:$0xff]  ;;  %528 = vmatpush.msrb.mxu1 %v484_v51 }
 0x116   :  { %568 = vmatpush.msra.mxu3 %v485_v53  ;;  %v497_v52 = vld [vmem:[#allocation4 + $0x4] ss:$8 sm:$0x3] }
 0x117   :  { %v250_v56 = vmax.f32 %v208_v55, 0.0  ;;  %v450_v55 = vld [vmem:[#allocation2 + $0x520] sm:$0xff]  ;;  %v499_v53 = vperm.slane %v497_v52, 0 }
 0x118   :  { %509 = vmatpush.msrb.mxu0 %v450_v55 }
 0x119   :  { %305 = vmatmul.f32.vlgmr.msrb.gmra.mxu2 %v250_v56  ;;  %v482_v56 = vld [vmem:[#allocation2 + $0x620] sm:$0xff] }
 0x11a   :  { %529 = vmatpush.msrb.mxu1 %v482_v56  ;;  %v500_v56 = vperm.slane %v497_v52, 1 }
 0x196   :  { %v326_v61 = vpop.f32.mrf.mxu3 }
 0x19c   :  { %v306_v59 = vpop.f32.mrf.mxu2 }
 0x19d   :  { %v307_v60 = vadd.f32 %v306_v59, %v287_v58  ;;  %v451_v58 = vld [vmem:[#allocation2 + $0x528] sm:$0xff] }
 0x19e   :  { %v483_v59 = vld [vmem:[#allocation2 + $0x628] sm:$0xff]  ;;  %549 = vmatpush.msra.mxu2 %v451_v58 }
 0x19f   :  { %v327_v62 = vadd.f32 %v326_v61, %v307_v60  ;;  %v448_v60 = vld [vmem:[#allocation2 + $0x510] sm:$0xff]  ;;  %569 = vmatpush.msra.mxu3 %v483_v59 }
 0x1a0   :  { %v480_v61 = vld [vmem:[#allocation2 + $0x610] sm:$0xff]  ;;  %510 = vmatpush.msrb.mxu0 %v448_v60 }
 0x1a1   :  { %v330_v63 = vand.u32 2147483647, %v327_v62  ;;  %v329_v10 = vmax.f32 %v327_v62, 0.0  ;;  %v449_v62 = vld [vmem:[#allocation2 + $0x518] sm:$0xff]  ;;  %530 = vmatpush.msrb.mxu1 %v480_v61 }
 0x1a2   :  { %550 = vmatpush.msra.mxu2 %v449_v62  ;;  %v586_v59 = vld [vmem:[#allocation4 + $0x5] ss:$8 sm:$0x3] }
 0x1a3   :  { %v331_v0 = vsub.f32 0.0, %v330_v63  ;;  %v481_v63 = vld [vmem:[#allocation2 + $0x618] sm:$0xff] }
 0x1a4   :  { %570 = vmatpush.msra.mxu3 %v481_v63 }
 0x1a5   :  { %v332_v1 = vmul.f32 1.442695, %v331_v0  ;;  %v446_v0 = vld [vmem:[#allocation2 + $0x500] sm:$0xff] }
 0x1a6   :  { %511 = vmatpush.msrb.mxu0 %v446_v0  ;;  %v588_v0 = vperm.slane %v586_v59, 0 }
 0x1a7   :  { %623 = vpow2.f32 %v332_v1  ;;  %v478_v1 = vld [vmem:[#allocation2 + $0x600] sm:$0xff] }
 0x1a8   :  { %531 = vmatpush.msrb.mxu1 %v478_v1 }
 0x1ad   :  { %v624_v2 = vpop.eup %623 }
 0x1ae   :  { %v334_v3 = vadd.f32 1.0, %v624_v2  ;;  %v337_v4 = vmul.f32 -0.5, %v624_v2  ;;  %v340_v6 = vand.u32 2147483647, %v624_v2 }
 0x1b0   :  { %625 = vlog2.f32 %v334_v3  ;;  %v338_v5 = vadd.f32 1.0, %v337_v4  ;;  %vm341_vm1 = vcmp.lt.f32.partialorder %v340_v6, 0.0004427343  ;;  %v479_v3 = vld [vmem:[#allocation2 + $0x608] sm:$0xff]  ;;  %v444_v4 = vld [vmem:[#allocation2 + $0x4f0] sm:$0xff]  ;;  %v445_v6 = vld [vmem:[#allocation2 + $0x4f8] sm:$0xff] }
 0x1b1   :  { %571 = vmatpush.msra.mxu3 %v479_v3  ;;  %512 = vmatpush.msrb.mxu0 %v444_v4 }
 0x1b2   :  { %v339_v9 = vmul.f32 %v624_v2, %v338_v5  ;;  %v447_v2 = vld [vmem:[#allocation2 + $0x508] sm:$0xff]  ;;  %v476_v5 = vld [vmem:[#allocation2 + $0x5f0] sm:$0xff] }
 0x1b3   :  { %551 = vmatpush.msra.mxu2 %v447_v2  ;;  %532 = vmatpush.msrb.mxu1 %v476_v5  ;;  %v589_v2 = vperm.slane %v586_v59, 1 }
 0x1b5   :  { %552 = vmatpush.msra.mxu2 %v445_v6 }
 0x1b6   :  { %v626_v7 = vpop.eup %625 }
 0x1b7   :  { %v336_v8 = vmul.f32 0.6931472, %v626_v7  ;;  %v477_v7 = vld [vmem:[#allocation2 + $0x5f8] sm:$0xff] }
 0x1b8   :  { %572 = vmatpush.msra.mxu3 %v477_v7  ;;  %v685_v7 = vmov 0  }
 0x1b9   :  { %v342_v11 = vsel %vm341_vm1, %v339_v9, %v336_v8  ;;  %v442_v8 = vld [vmem:[#allocation2 + $0x4e0] sm:$0xff]  ;;  %621 = vset.pattern.permute.xlu1 %v685_v7  ;;  %622 = vset.pattern.permute.xlu0 %v685_v7 }
 0x1ba   :  { %v715_v12 = vadd.f32 %v342_v11, %v329_v10  ;;  %v474_v9 = vld [vmem:[#allocation2 + $0x5e0] sm:$0xff]  ;;  %v443_v11 = vld [vmem:[#allocation2 + $0x4e8] sm:$0xff]  ;;  %513 = vmatpush.msrb.mxu0 %v442_v8  ;;  %v597_v8 = vld [vmem:[#allocation4 + $0x6] ss:$0 sm:$0xff] }
 0x1bb   :  { %533 = vmatpush.msrb.mxu1 %v474_v9  ;;  %553 = vmatpush.msra.mxu2 %v443_v11 }
 0x1bc   :  { %v345_v13 = vsel %vm344_vm2, %v715_v12, 0.0  ;;  %514 = vmatpush.msrb.mxu0 %v440_v15 }
 0x1bd   :  { %346 = vadd.xlane.f32.xlu0 %v345_v13  ;;  %v475_v13 = vld [vmem:[#allocation2 + $0x5e8] sm:$0xff]  ;;  %534 = vmatpush.msrb.mxu1 %v472_v16 }
 0x1be   :  { %573 = vmatpush.msra.mxu3 %v475_v13  ;;  %554 = vmatpush.msra.mxu2 %v441_v17 }
 0x1bf   :  { %515 = vmatpush.msrb.mxu0 %v438_v20  ;;  %535 = vmatpush.msrb.mxu1 %v470_v21 }
 0x1c0   :  { %574 = vmatpush.msra.mxu3 %v473_v18  ;;  %555 = vmatpush.msra.mxu2 %v439_v23 }
 0x1c1   :  { %516 = vmatpush.msrb.mxu0 %v436_v32  ;;  %536 = vmatpush.msrb.mxu1 %v468_v33 }
 0x1c2   :  { %575 = vmatpush.msra.mxu3 %v471_v24  ;;  %556 = vmatpush.msra.mxu2 %v437_v34 }
 0x1c3   :  { %517 = vmatpush.msrb.mxu0 %v434_v36  ;;  %537 = vmatpush.msrb.mxu1 %v466_v37 }
 0x1c4   :  { %576 = vmatpush.msra.mxu3 %v469_v35  ;;  %557 = vmatpush.msra.mxu2 %v435_v38 }
 0x1c5   :  { %518 = vmatpush.msrb.mxu0 %v432_v39  ;;  %538 = vmatpush.msrb.mxu1 %v464_v40 }
 0x1c6   :  { %558 = vmatpush.msra.mxu2 %v433_v41 }
 0x230   :  { %v347_v54 = vpop.xlane.xlu0 %346 }
 0x231   :  { %v719_v57 = vmul.f32 0.015625, %v347_v54 }
 0x233   :  { %627 = vrcp.f32 %v719_v57  ;;  %v360_v22 = vand.u32 2147483648, %v719_v57  ;;  %v358_v26 = vand.u32 2147483647, %v719_v57  ;;  %vm354_vm4 = vweird.f32 %v719_v57 }
 0x235   :  { %v361_v28 = vor.u32 1.1754944e-38, %v360_v22  ;;  %vm359_vm6 = vcmp.eq.f32.partialorder %v358_v26, 8.507059e+37 }
 0x239   :  { %v628_v10 = vpop.eup %627 }
 0x23a   :  { %v350_v14 = vmul.f32 %v628_v10, %v719_v57  ;;  %vm355_vm3 = vweird.f32 %v628_v10 }
 0x23b   :  { %vm356_vm5 = vmor %vm354_vm4, %vm355_vm3 }
 0x23c   :  { %v351_v19 = vsub.f32 1.0, %v350_v14 }
 0x23e   :  { %v352_v25 = vmul.f32 %v628_v10, %v351_v19 }
 0x240   :  { %v353_v27 = vadd.f32 %v628_v10, %v352_v25 }
 0x242   :  { %v357_v29 = vsel %vm356_vm5, %v628_v10, %v353_v27 }
 0x243   :  { %v362_v30 = vsel %vm359_vm6, %v361_v28, %v357_v29 }
 0x244   :  { %v727_v31 = vmul.f32 %v362_v30, %v715_v12  ;;  %v467_v12 = vld [vmem:[#allocation2 + $0x5a8] sm:$0xff] }
 0x245   :  { %577 = vmatpush.msra.mxu3 %v467_v12 }
 0x246   :  { %614 = vmatmul.msk.f32.vlgmr.msra.gmra.mxu0 %vm344_vm2, %v727_v31  ;;  %615 = vmatmul.msk.f32.vlgmr.msra.gmra.mxu1 %vm344_vm2, %v727_v31 }
 0x247   :  { %578 = vmatpush.msra.mxu3 %v465_v42 }
 0x2c3   :  { %v407_v46 = vpop.f32.mrf.mxu0  ;;  %v427_v47 = vpop.f32.mrf.mxu1 }
 0x2c4   :  { %v408_v48 = vadd.f32 %v407_v46, %v383_v44  ;;  %v428_v49 = vadd.f32 %v427_v47, %v384_v45 }
 0x2c6   :  { %v430_v50 = vmax.f32 %v408_v48, 0.0  ;;  %v431_v51 = vmax.f32 %v428_v49, 0.0 }
 0x2c8   :  { %519 = vmatmul.f32.vlgmr.msrb.gmra.mxu0 %v430_v50  ;;  %539 = vmatmul.f32.vlgmr.msrb.gmra.mxu1 %v431_v51 }
 0x2c9   :  { %559 = vmatmul.f32.vlgmr.msra.gmra.mxu2 %v430_v50  ;;  %579 = vmatmul.f32.vlgmr.msra.gmra.mxu3 %v431_v51 }
 0x345   :  { %v520_v54 = vpop.f32.mrf.mxu0  ;;  %v540_v57 = vpop.f32.mrf.mxu1 }
 0x346   :  { %v521_v55 = vadd.f32 %v520_v54, %v499_v53 }
 0x348   :  { %v541_v58 = vadd.f32 %v540_v57, %v521_v55 }
 0x34a   :  { %v583_v63 = vmax.f32 %v541_v58, 0.0 }
 0x34c   :  { %v560_v60 = vpop.f32.mrf.mxu2  ;;  %v580_v62 = vpop.f32.mrf.mxu3  ;;  %v592_v4 = vmul.f32 %v588_v0, %v583_v63 }
 0x34d   :  { %v561_v61 = vadd.f32 %v560_v60, %v500_v56 }
 0x34f   :  { %v581_v1 = vadd.f32 %v580_v62, %v561_v61 }
 0x351   :  { %v584_v3 = vmax.f32 %v581_v1, 0.0 }
 0x353   :  { %v593_v5 = vmul.f32 %v589_v2, %v584_v3 }
 0x355   :  { %v594_v6 = vadd.f32 %v593_v5, %v592_v4 }
 0x357   :  { %595 = vadd.xlane.f32.xlu0 %v594_v6 }
 0x3ca   :  { %v596_v9 = vpop.xlane.xlu0 %595 }
 0x3cb   :  { %v598_v10 = vadd.f32 %v597_v8, %v596_v9 }
 0x3cd   :  { %601 = vperm.xlu1 %621, %v598_v10  }
 0x43f   :  { %v602_v11 = vpop.permute.xlu1 %601 }
 0x440   :  { %v604_v13 = vsel %vm344_vm2, %v727_v31, %v602_v11 }
 0x441   :  { %605 = vst [vmem:[%s741_s3] sm:$0xff] %v604_v13 }
 0x442   :  { %610 = vsyncpa [#allocation3], 1 }
 0x443   :  { %611 = vsyncpa [#allocation5], 1 }

</bundles_post_ra>
